<compile_context>
chip_gen: v5e
topology: v5e:2x2
jax: 0.10.0
libtpu: 0.0.40
codegen_flags: <defaults>
</compile_context>

<pallas_src>
import functools

import jax
import jax.numpy as jnp
from jax.experimental import pallas as pl
from jax.experimental.pallas import tpu as pltpu

_LANE = 128


def _round_up(v, m):
    return (v + m - 1) // m * m


def _lane_bytes(cols, dtype_bytes=4):
    # VMEM footprint of one row of a (rows, cols) f32 buffer (lanes pad to 128).
    return _round_up(max(int(cols), 1), _LANE) * dtype_bytes


def _tpu_vmem_capacity_bytes():
    # Per-generation physical VMEM (v5e/v6e: 128 MiB, v7x: 64 MiB per TC).
    try:
        return int(pltpu.get_tpu_info().vmem_capacity_bytes)
    except Exception:
        return 64 << 20  # conservative fallback (v7x per-TensorCore VMEM)


# ---------------------------------------------------------------------------
# Prep kernel: runs once (grid=()).  Only the (basic_col, para)-dependent norms.
#   l1mat_ref  : (1, Ppad) = max over rows of |basic_col| @ |para|
#   l1size_ref : (1, 1)    = sum |basic_col @ para|
# ---------------------------------------------------------------------------
def _pi_prep_kernel(bc_ref, para_ref, l1mat_ref, l1size_ref):
    bc = bc_ref[...]                                   # (D, K)
    para = para_ref[...]                               # (K, Ppad), zero-padded cols

    # matrix inf-norm per column p:
    #   max_d sum_k |bc[d,k] * para[k,p]| = max over rows of (|bc| @ |para|)
    row_sums = jnp.dot(jnp.abs(bc), jnp.abs(para),
                       preferred_element_type=jnp.float32)         # (D, Ppad)
    l1mat_ref[...] = jnp.max(row_sums, axis=0, keepdims=True)      # (1, Ppad)

    # l1_norm_size = || bc @ para ||_1  (flattened vector 1-norm; no threshold cut)
    prod = jnp.dot(bc, para, preferred_element_type=jnp.float32)   # (D, Ppad)
    l1size_ref[...] = jnp.sum(jnp.abs(prod), axis=(0, 1), keepdims=True)


# ---------------------------------------------------------------------------
# Streaming kernel: one batch tile per grid step.
#   coef_pi recomputed from tiny resident operands (no HBM round-trip), then
#   pis tile = log(x tile) @ coef_pi.  Only the first P lanes are stored to the
#   narrow (tn, P) output block.
# ---------------------------------------------------------------------------
def _pi_stream_kernel(x_ref, bc_ref, para_ref, pis_ref, *,
                      lowest_para_threshold, p):
    para = para_ref[...]                                            # (K, Ppad)
    thr = jnp.asarray(lowest_para_threshold, para.dtype)
    cut = ((para >= thr) | (para <= -thr)).astype(para.dtype)
    coef = jnp.dot(bc_ref[...], para * cut,
                   preferred_element_type=jnp.float32)              # (D, Ppad)
    # TODO(synk): if profiling on v7x shows the EUP log as binding (D occupies
    # only D/128 of each vreg's lanes), pack lane-dense before the log.
    pis = jnp.dot(jnp.log(x_ref[...]), coef,
                  preferred_element_type=jnp.float32)               # (tn, Ppad)
    pis_ref[...] = pis[:, :p]                                       # store only useful lanes


def _choose_tile_n(n, d, p, ppad, budget_bytes):
    # Per-row VMEM cost (f32, lane-padded): double-buffered x tile +
    # double-buffered pis tile + in-kernel log / dot temporaries.
    per_row = (2 * _lane_bytes(d)
               + 2 * _lane_bytes(p)
               + _lane_bytes(d)
               + ppad * 4)
    tn = budget_bytes // per_row
    tn = max(8, min(8192, (tn // 8) * 8))              # mult. of 8 sublanes, big cap
    # v7x megacore: guarantee >= 2 grid steps so both TensorCores get work.
    tn = min(tn, max(8, _round_up(pl.cdiv(n, 2), 8)))
    tn = min(tn, _round_up(n, 8))                      # never bigger than (padded) batch
    return int(tn)


@functools.partial(jax.jit, static_argnames=("lowest_para_threshold",))
def pi_construct_forward(x, basic_col, para, lowest_para_threshold=0.0):
    """Returns (pis (N,P), l1_norm_matrix (P,), l1_norm_size scalar)."""
    N, D = x.shape
    D2, K = basic_col.shape
    K2, P = para.shape
    assert D == D2 and K == K2

    x = x.astype(jnp.float32)
    basic_col = basic_col.astype(jnp.float32)
    para = para.astype(jnp.float32)

    ppad = _round_up(P, _LANE)                          # lane-dense in-kernel compute only
    para_pad = jnp.pad(para, ((0, 0), (0, ppad - P)))   # zero cols contribute 0 everywhere

    # ---- one-shot prep kernel: the two (basic_col, para)-only norms ----
    l1mat_pad, l1size = pl.pallas_call(
        _pi_prep_kernel,
        out_shape=(
            jax.ShapeDtypeStruct((1, ppad), jnp.float32),
            jax.ShapeDtypeStruct((1, 1), jnp.float32),
        ),
        grid=(),
        in_specs=[
            pl.BlockSpec((D, K), lambda: (0, 0)),
            pl.BlockSpec((K, ppad), lambda: (0, 0)),
        ],
        out_specs=(
            pl.BlockSpec((1, ppad), lambda: (0, 0)),
            pl.BlockSpec((1, 1), lambda: (0, 0)),
        ),
    )(basic_col, para_pad)

    # ---- streaming kernel: pipeline x over the batch axis, narrow (N, P) output ----
    vmem_cap = _tpu_vmem_capacity_bytes()
    budget = vmem_cap * 3 // 8                          # tile-planning budget per generation
    tn = _choose_tile_n(N, D, P, ppad, budget)
    grid = (pl.cdiv(N, tn),)

    vmem_needed = (2 * tn * _lane_bytes(D)              # x, double-buffered
                   + 2 * tn * _lane_bytes(P)            # pis, double-buffered
                   + tn * (_lane_bytes(D) + ppad * 4)   # log / padded-dot temps
                   + D * _lane_bytes(K) + K * ppad * 4 + D * ppad * 4)  # residents + coef
    vmem_cap_limit = min(vmem_cap * 3 // 4, 100 << 20)
    vmem_limit = int(min(max(int(vmem_needed * 1.3), 16 << 20), vmem_cap_limit))

    stream = functools.partial(_pi_stream_kernel,
                               lowest_para_threshold=lowest_para_threshold, p=P)
    pis = pl.pallas_call(
        stream,
        out_shape=jax.ShapeDtypeStruct((N, P), jnp.float32),
        grid=grid,
        in_specs=[
            pl.BlockSpec((tn, D), lambda i: (i, 0)),       # streamed batch tile
            pl.BlockSpec((D, K), lambda i: (0, 0)),        # resident basic_col
            pl.BlockSpec((K, ppad), lambda i: (0, 0)),     # resident para (padded lanes)
        ],
        out_specs=pl.BlockSpec((tn, P), lambda i: (i, 0)),  # narrow output, no HBM padding
        compiler_params=pltpu.CompilerParams(
            dimension_semantics=("parallel",),             # v7x: shard N over 2 TCs
            vmem_limit_bytes=vmem_limit,
        ),
    )(x, basic_col, para_pad)

    l1_norm_matrix = l1mat_pad[0, :P]   # (P,) array; callers index it
    l1_norm_size = l1size[0, 0]
    # TODO(synk): torch module runs float64; f32 here may drift for ill-conditioned inputs.
    # NOTE: when tn does not divide N, the trailing partial tile feeds padded x rows into
    # jnp.log; harmless (rows independent, padding never written back), but do not add
    # cross-row reductions to the streaming kernel without masking.
    return pis, l1_norm_matrix, l1_norm_size


def _reference_forward(x, basic_col, para, thr=0.0):
    cut = ((para >= thr) | (para <= -thr)).astype(para.dtype)
    coef_pi = basic_col @ (para * cut)
    pis = jnp.log(x) @ coef_pi
    lambda_phi = basic_col[:, :, None] * para[None, :, :]
    l1_norm_matrix = jnp.stack(
        [jnp.max(jnp.sum(jnp.abs(lambda_phi[:, :, p]), axis=1))
         for p in range(para.shape[1])])
    l1_norm_size = jnp.sum(jnp.abs(basic_col @ para))
    return pis, l1_norm_matrix, l1_norm_size


if __name__ == "__main__":
    # Small shapes consistent with the module: batch, variables, basic dims, ndimensionless.
    N, D, K, P = 8, 16, 8, 4
    key = jax.random.PRNGKey(0)
    k_x, k_bc, k_para = jax.random.split(key, 3)

    # x must be positive (log is taken).
    x = jax.random.uniform(k_x, (N, D), dtype=jnp.float32, minval=0.5, maxval=2.0)
    # basic_col: the (fixed) dimension matrix passed to __init__.
    basic_col = jax.random.normal(k_bc, (D, K), dtype=jnp.float32)
    # para: torch.rand((K, P)) -> uniform [0, 1)
    para = jax.random.uniform(k_para, (K, P), dtype=jnp.float32)

    pis, l1_mat, l1_size = pi_construct_forward(x, basic_col, para,
                                                lowest_para_threshold=0.0)
    jax.block_until_ready((pis, l1_mat, l1_size))

    # Sanity-check against a pure-JAX reference.
    ref_pis, ref_mat, ref_size = _reference_forward(x, basic_col, para, 0.0)
    assert pis.shape == (N, P)
    assert jnp.allclose(pis, ref_pis, atol=1e-4, rtol=1e-4)
    assert jnp.allclose(l1_mat, ref_mat, atol=1e-4, rtol=1e-4)
    assert jnp.allclose(l1_size, ref_size, atol=1e-4, rtol=1e-4)

    print("KERNEL_OK")
</pallas_src>

<mosaic_0001>
module attributes {stable_mosaic.version = 11 : i64} {
  func.func @_pi_prep_kernel(%arg0: memref<16x8xf32, #tpu.memory_space<vmem>>, %arg1: memref<8x128xf32, #tpu.memory_space<vmem>>, %arg2: memref<1x128xf32, #tpu.memory_space<vmem>>, %arg3: memref<1x1xf32, #tpu.memory_space<vmem>>) attributes {dimension_semantics = [], scalar_prefetch = 0 : i64, scratch_operands = 0 : i64, tpu.core_type = #tpu.core_type<tc>} {
    %c0 = arith.constant 0 : index
    %c0_0 = arith.constant 0 : index
    %0 = vector.load %arg0[%c0, %c0_0] : memref<16x8xf32, #tpu.memory_space<vmem>>, vector<16x8xf32>
    %c0_1 = arith.constant 0 : index
    %c0_2 = arith.constant 0 : index
    %1 = vector.load %arg1[%c0_1, %c0_2] : memref<8x128xf32, #tpu.memory_space<vmem>>, vector<8x128xf32>
    %2 = math.absf %0 : vector<16x8xf32>
    %3 = math.absf %1 : vector<8x128xf32>
    %cst = arith.constant dense<0.000000e+00> : vector<16x128xf32>
    %4 = tpu.matmul %2, %3, %cst {dimension_numbers = #tpu.dot_dimension_numbers<[1], [0], [0], [1], [0, 0, 1, 1], [], []>} : vector<16x8xf32>, vector<8x128xf32>, vector<16x128xf32> -> vector<16x128xf32>
    %cst_3 = arith.constant dense<0xFF800000> : vector<128xf32>
    %5 = vector.multi_reduction <maximumf>, %4, %cst_3 [0] : vector<16x128xf32> to vector<128xf32>
    %6 = vector.shape_cast %5 : vector<128xf32> to vector<1x128xf32>
    %c0_4 = arith.constant 0 : index
    %c0_5 = arith.constant 0 : index
    %7 = vector.load %arg2[%c0_4, %c0_5] : memref<1x128xf32, #tpu.memory_space<vmem>>, vector<1x128xf32>
    tpu.vector_store %arg2[%c0_4, %c0_5], %6 {strides = array<i32>} : memref<1x128xf32, #tpu.memory_space<vmem>>, vector<1x128xf32>,
    %cst_6 = arith.constant dense<0.000000e+00> : vector<16x128xf32>
    %8 = tpu.matmul %0, %1, %cst_6 {dimension_numbers = #tpu.dot_dimension_numbers<[1], [0], [0], [1], [0, 0, 1, 1], [], []>} : vector<16x8xf32>, vector<8x128xf32>, vector<16x128xf32> -> vector<16x128xf32>
    %9 = math.absf %8 : vector<16x128xf32>
    %10 = vector.shape_cast %9 : vector<16x128xf32> to vector<1x16x128xf32>
    %cst_7 = arith.constant dense<0.000000e+00> : vector<1xf32>
    %11 = vector.multi_reduction <add>, %10, %cst_7 [1, 2] : vector<1x16x128xf32> to vector<1xf32>
    %12 = vector.shape_cast %11 : vector<1xf32> to vector<1x1x1xf32>
    %13 = vector.extract %12[0, 0, 0] : f32 from vector<1x1x1xf32>
    %14 = vector.broadcast %13 : f32 to vector<1x1xf32>
    %c0_8 = arith.constant 0 : index
    %c0_9 = arith.constant 0 : index
    %15 = vector.load %arg3[%c0_8, %c0_9] : memref<1x1xf32, #tpu.memory_space<vmem>>, vector<1x1xf32>
    tpu.vector_store %arg3[%c0_8, %c0_9], %14 {strides = array<i32>} : memref<1x1xf32, #tpu.memory_space<vmem>>, vector<1x1xf32>,
    return
  }
}

module attributes {stable_mosaic.version = 11 : i64} {
  func.func @_pi_stream_kernel(%arg0: i32, %arg1: memref<8x16xf32, #tpu.memory_space<vmem>>, %arg2: memref<16x8xf32, #tpu.memory_space<vmem>>, %arg3: memref<8x128xf32, #tpu.memory_space<vmem>>, %arg4: memref<8x4xf32, #tpu.memory_space<vmem>>) attributes {dimension_semantics = [#tpu.dimension_semantics<parallel>], iteration_bounds = array<i64: 1>, scalar_prefetch = 0 : i64, scratch_operands = 0 : i64, tpu.core_type = #tpu.core_type<tc>, window_params = [{transform_indices = @transform_0, window_bounds = array<i64: 8, 16>}, {pipeline_mode = #tpu.pipeline_mode<synchronous>, transform_indices = @transform_1, window_bounds = array<i64: 16, 8>}, {pipeline_mode = #tpu.pipeline_mode<synchronous>, transform_indices = @transform_2, window_bounds = array<i64: 8, 128>}, {transform_indices = @transform_3, window_bounds = array<i64: 8, 4>}]} {
    %c0 = arith.constant 0 : index
    %c0_0 = arith.constant 0 : index
    %0 = vector.load %arg3[%c0, %c0_0] : memref<8x128xf32, #tpu.memory_space<vmem>>, vector<8x128xf32>
    %cst = arith.constant 0.000000e+00 : f32
    %1 = vector.broadcast %cst : f32 to vector<8x128xf32>
    %2 = arith.cmpf oge, %0, %1 : vector<8x128xf32>
    %cst_1 = arith.constant 0.000000e+00 : f32
    %cst_2 = arith.constant 0.000000e+00 : f32
    %3 = arith.subf %cst_1, %cst_2 : f32
    %4 = vector.broadcast %3 : f32 to vector<8x128xf32>
    %5 = arith.cmpf ole, %0, %4 : vector<8x128xf32>
    %6 = arith.ori %2, %5 : vector<8x128xi1>
    %7 = arith.extui %6 : vector<8x128xi1> to vector<8x128xi32>
    %8 = arith.sitofp %7 : vector<8x128xi32> to vector<8x128xf32>
    %c0_3 = arith.constant 0 : index
    %c0_4 = arith.constant 0 : index
    %9 = vector.load %arg2[%c0_3, %c0_4] : memref<16x8xf32, #tpu.memory_space<vmem>>, vector<16x8xf32>
    %10 = arith.mulf %0, %8 : vector<8x128xf32>
    %cst_5 = arith.constant dense<0.000000e+00> : vector<16x128xf32>
    %11 = tpu.matmul %9, %10, %cst_5 {dimension_numbers = #tpu.dot_dimension_numbers<[1], [0], [0], [1], [0, 0, 1, 1], [], []>} : vector<16x8xf32>, vector<8x128xf32>, vector<16x128xf32> -> vector<16x128xf32>
    %c0_6 = arith.constant 0 : index
    %c0_7 = arith.constant 0 : index
    %12 = vector.load %arg1[%c0_6, %c0_7] : memref<8x16xf32, #tpu.memory_space<vmem>>, vector<8x16xf32>
    %13 = math.log %12 : vector<8x16xf32>
    %cst_8 = arith.constant dense<0.000000e+00> : vector<8x128xf32>
    %14 = tpu.matmul %13, %11, %cst_8 {dimension_numbers = #tpu.dot_dimension_numbers<[1], [0], [0], [1], [0, 0, 1, 1], [], []>} : vector<8x16xf32>, vector<16x128xf32>, vector<8x128xf32> -> vector<8x128xf32>
    %15 = vector.extract_strided_slice %14 {offsets = [0, 0], sizes = [8, 4], strides = [1, 1]} : vector<8x128xf32> to vector<8x4xf32>
    %c0_9 = arith.constant 0 : index
    %c0_10 = arith.constant 0 : index
    %16 = vector.load %arg4[%c0_9, %c0_10] : memref<8x4xf32, #tpu.memory_space<vmem>>, vector<8x4xf32>
    tpu.vector_store %arg4[%c0_9, %c0_10], %15 {strides = array<i32>} : memref<8x4xf32, #tpu.memory_space<vmem>>, vector<8x4xf32>,
    return
  }
  func.func @transform_0(%arg0: i32) -> (i32, i32) {
    %c0_i32 = arith.constant 0 : i32
    %c0_i32_0 = arith.constant 0 : i32
    return %arg0, %c0_i32 : i32, i32
  }
  func.func @transform_1(%arg0: i32) -> (i32, i32) {
    %c0_i32 = arith.constant 0 : i32
    %c0_i32_0 = arith.constant 0 : i32
    %c0_i32_1 = arith.constant 0 : i32
    return %c0_i32, %c0_i32_0 : i32, i32
  }
  func.func @transform_2(%arg0: i32) -> (i32, i32) {
    %c0_i32 = arith.constant 0 : i32
    %c0_i32_0 = arith.constant 0 : i32
    %c0_i32_1 = arith.constant 0 : i32
    return %c0_i32, %c0_i32_0 : i32, i32
  }
  func.func @transform_3(%arg0: i32) -> (i32, i32) {
    %c0_i32 = arith.constant 0 : i32
    %c0_i32_0 = arith.constant 0 : i32
    return %arg0, %c0_i32 : i32, i32
  }
}

</mosaic_0001>

<bundles_post_ra>
// kernel: pi_construct_forward.3
= control target key start
LH: loop header
LB: loop body
LE: loop exit
PB: predicated region body
PF: predicated region fallthrough
CT: control target
= control target key end

     0   :  { %v94_v1 = vmov 0.0   ;;  %vm23_vm3 = vcmask 64512   ;;  %vm56_vm4 = vcmask 130048   ;;  %vm80_vm5 = vcmask 31744   ;;  %s130_s2 = inlined_call_operand.vmem [shape: f32[8,128], index: 2, kind: input, shape index: {}]   ;;  %s131_s1 = inlined_call_operand.vmem [shape: f32[16,8], index: 1, kind: input, shape index: {}]   ;;  %s132_s0 = inlined_call_operand.vmem [shape: f32[8,16], index: 0, kind: input, shape index: {}]   ;;  %s133_s3 = inlined_call_operand.vmem [shape: f32[8,4], index: 3, kind: output, shape index: {}]  }
   0x1   :  { %v14_v0 = vld [vmem:[%s130_s2] sm:$0xff]  ;;  %v21_v4 = vld [vmem:[%s131_s1 + $0x8] sm:$0xff] }
   0x2   :  { %vm15_vm0 = vcmp.ge.f32.partialorder %v14_v0, 0.0  ;;  %vm16_vm1 = vcmp.le.f32.partialorder %v14_v0, 0.0  ;;  %v20_v5 = vld [vmem:[%s131_s1] sm:$0xff] }
   0x3   :  { %vm17_vm2 = vmor %vm15_vm0, %vm16_vm1  ;;  %v53_v6 = vld [vmem:[%s132_s0] sm:$0xff] }
   0x4   :  { %v86_v2 = vsel %vm17_vm2, 1.0, %v94_v1  ;;  %92 = vlog2.f32 %v53_v6 }
   0x5   :  { %v22_v3 = vmul.f32 %v86_v2, %v14_v0 }
   0x7   :  { %90 = vmatpush.msra.mxu2 %v22_v3  ;;  %45 = vmatpush.msra.mxu0 %v22_v3 }
   0x8   :  { %88 = vmatmul.msk.f32.vlgmr.msra.gmra.mxu2 %vm23_vm3, %v21_v4  ;;  %87 = vmatmul.msk.f32.vlgmr.msra.gmra.mxu0 %vm23_vm3, %v20_v5 }
   0xa   :  { %v93_v7 = vpop.eup %92 }
   0xb   :  { %v55_v10 = vmul.f32 0.6931472, %v93_v7 }
  0x85   :  { %v47_v9 = vpop.f32.mrf.mxu0 }
  0x8b   :  { %v50_v8 = vpop.f32.mrf.mxu2 }
  0x8c   :  { %74 = vmatpush.msra.mxu1 %v50_v8 }
  0x8e   :  { %75 = vmatpush.msra.mxu1 %v47_v9 }
  0x8f   :  { %89 = vmatmul.msk.f32.vlgmr.msra.gmra.mxu1 %vm56_vm4, %v55_v10 }
 0x10c   :  { %v77_v11 = vpop.f32.mrf.mxu1 }
 0x10d   :  { %81 = vst.msk [vmem:[%s133_s3] sm:$0xff] %vm80_vm5, %v77_v11 }

// kernel: pi_construct_forward.2
= control target key start
LH: loop header
LB: loop body
LE: loop exit
PB: predicated region body
PF: predicated region fallthrough
CT: control target
= control target key end

     0   :  { %vm20_vm0 = vcmask 64512   ;;  %s193_s0 = inlined_call_operand.vmem [shape: f32[16,8], index: 0, kind: input, shape index: {}]   ;;  %s194_s1 = inlined_call_operand.vmem [shape: f32[8,128], index: 1, kind: input, shape index: {}]   ;;  %s195_s2 = inlined_call_operand.vmem [shape: f32[1,128], index: 2, kind: output, shape index: {0}]   ;;  %s196_s3 = inlined_call_operand.hbm [shape: f32[1,1], index: 3, kind: output, shape index: {1}]  }
   0x1   :  { %v16_v0 = vld [vmem:[%s194_s1] sm:$0xff]  ;;  %v15_v1 = vld [vmem:[%s193_s0 + $0x8] sm:$0xff] }
   0x2   :  { %v14_v2 = vld [vmem:[%s193_s0] sm:$0xff]  ;;  %127 = vmatpush.msra.mxu3 %v16_v0  ;;  %79 = vmatpush.msra.mxu1 %v16_v0 }
   0x3   :  { %9 = vsyncpa [#allocation3], 0  ;;  %125 = vmatmul.msk.f32.vlgmr.msra.gmra.mxu3 %vm20_vm0, %v15_v1  ;;  %124 = vmatmul.msk.f32.vlgmr.msra.gmra.mxu1 %vm20_vm0, %v14_v2  ;;  %v18_v3 = vand.u32 2147483647, %v15_v1  ;;  %v17_v4 = vand.u32 2147483647, %v14_v2 }
   0x4   :  { %v19_v5 = vand.u32 2147483647, %v16_v0  ;;  %s157_s18 = smov [#allocation2]   ;;  %s111_s22 = sshll.u32 %s196_s3, 4  ;;  %vm100_vm1 = vcmask 0   ;;  %s112_s22 = int_to_ptr.hbm [resolvable:$true] %s111_s22 }
   0x5   :  { %s109_s19 = sshll.u32 %s157_s18, 4  ;;  %s110_s19 = int_to_ptr.vmem [resolvable:$true] %s109_s19 }
   0x6   :  { %126 = vmatpush.msra.mxu2 %v19_v5  ;;  %42 = vmatpush.msra.mxu0 %v19_v5 }
   0x7   :  { %123 = vmatmul.msk.f32.vlgmr.msra.gmra.mxu2 %vm20_vm0, %v18_v3  ;;  %122 = vmatmul.msk.f32.vlgmr.msra.gmra.mxu0 %vm20_vm0, %v17_v4 }
  0x80   :  { %v81_v6 = vpop.f32.mrf.mxu1 }
  0x81   :  { %v87_v7 = vand.u32 2147483647, %v81_v6 }
  0x84   :  { %v44_v11 = vpop.f32.mrf.mxu0 }
  0x86   :  { %v84_v8 = vpop.f32.mrf.mxu3 }
  0x87   :  { %v88_v9 = vand.u32 2147483647, %v84_v8 }
  0x89   :  { %v89_v10 = vadd.f32 %v88_v9, %v87_v7 }
  0x8a   :  { %v47_v12 = vpop.f32.mrf.mxu2 }
  0x8b   :  { %90 = vadd.xlane.f32.xlu0 %v89_v10  ;;  %v50_v13 = vmax.f32 %v44_v11, %v47_v12 }
  0x8d   :  { %v51_v14 = vrot.slane %v50_v13, 4 }
  0x8f   :  { %v52_v15 = vmax.f32 %v50_v13, %v51_v14 }
  0x91   :  { %v53_v16 = vrot.slane %v52_v15, 2 }
  0x93   :  { %v54_v17 = vmax.f32 %v52_v15, %v53_v16 }
  0x95   :  { %v55_v18 = vrot.slane %v54_v17, 1 }
  0x97   :  { %v56_v20 = vmax.f32 %v54_v17, %v55_v18 }
  0x99   :  { %57 = vst [vmem:[%s195_s2] sm:$0x1] %v56_v20 }
  0xfe   :  { %v91_v19 = vpop.xlane.xlu0 %90 }
  0xff   :  { %v92_v21 = vrot.slane %v91_v19, 4 }
 0x101   :  { %v93_v22 = vadd.f32 %v92_v21, %v91_v19 }
 0x103   :  { %v94_v23 = vrot.slane %v93_v22, 2 }
 0x105   :  { %v95_v24 = vadd.f32 %v94_v23, %v93_v22 }
 0x107   :  { %v96_v25 = vrot.slane %v95_v24, 1 }
 0x109   :  { %v97_v26 = vadd.f32 %v96_v25, %v95_v24 }
 0x10b   :  { %128 = vpush %v97_v26 }
 0x13c   :  { %s129_s23 = spop %128 }
 0x13d   :  { %v99_v27 = vstv %s129_s23 }
 0x13e   :  { %101 = vst.msk [vmem:[#allocation2] sm:$0x1] %vm100_vm1, %v99_v27 }
 0x13f   :  { %114 = dma.vmem_to_hbm [thread:$0]  %s110_s19, 16, %s112_s22, [#allocation3]  }
 0x140   :  { %155 = dma.done.wait [#allocation3], 16  }
 0x141   :  { %156 = vsyncadd [#allocation3], 4294967280 }
 0x142   :  { %121 = vsyncpa [#allocation3], 1 }

</bundles_post_ra>
